<compile_context>
chip_gen: v6e
topology: v6e:2x2x1
jax: 0.10.0
libtpu: 0.0.40
codegen_flags: <defaults>
</compile_context>

<pallas_src>
import numpy as np
import jax
import jax.numpy as jnp
from jax.experimental import pallas as pl
from jax.experimental.pallas import tpu as pltpu

# ---- sizes (small, consistent with the module) ----
V = 64            # output_dim (vocab)
E = 16            # emb_dim
EH = 16           # enc_hid_dim  -> bidirectional encoder feature DE = 2*EH
DE = 2 * EH
H = 32            # dec_hid_dim
A = 32            # attention hidden dim
S = 8             # src_len
B = 2             # batch
ATTN_IN = DE + H  # attention.attn_in
OUT_W = 128       # lane-dense packed output width: [logits(V) | h_new(H) | pad]


def _decoder_kernel(emb_ref, h_ref, encf_ref,
                    wh_ref, wenc_ref, wih_ref, wout_ref,
                    out_ref):
  f32 = jnp.float32
  emb = emb_ref[...]                                   # [B, E]
  h = h_ref[...]                                       # [B, H]
  encf = encf_ref[...]                                 # [B*S, DE] (row = b*S + s)
  ones_b = jnp.ones((B, 1), f32)                       # bias column

  # ---------- fused h-consuming dot: [gh | e_h] (128 lanes, biases folded) ----------
  h_aug = jnp.concatenate([h, ones_b], axis=1)         # [B, H+1]
  gh_eh = jnp.dot(h_aug, wh_ref[...], preferred_element_type=f32)   # [B, 3H+A]=[B,128]
  gh = gh_eh[:, :3 * H]                                # [B, 3H]  (+ bhh)
  e_h = gh_eh[:, 3 * H:]                               # [B, A]   (+ ba)

  # ---------- attention over flattened [B*S, DE] encoder rows ----------
  enc_part = jnp.dot(encf, wenc_ref[...], preferred_element_type=f32)  # [B*S, A]

  # constant block-diagonal segment matrices (built from iota; no int division)
  jj = jax.lax.broadcasted_iota(jnp.int32, (B * S, B), 0)
  bb = jax.lax.broadcasted_iota(jnp.int32, (B * S, B), 1)
  segT = ((jj >= bb * S) & (jj < (bb + 1) * S)).astype(f32)            # [B*S, B]
  rr = jax.lax.broadcasted_iota(jnp.int32, (B, B * S), 0)
  cc = jax.lax.broadcasted_iota(jnp.int32, (B, B * S), 1)
  seg = ((cc >= rr * S) & (cc < (rr + 1) * S)).astype(f32)             # [B, B*S]

  # broadcast hidden contribution to every source row of its batch (MXU dot)
  e_h_b = jnp.dot(segT, e_h, preferred_element_type=f32)               # [B*S, A]
  energy = jnp.tanh(enc_part + e_h_b)                                  # [B*S, A]
  scores = jnp.sum(energy, axis=1, keepdims=True)                      # [B*S, 1]

  # softmax over source positions within each batch group; global max shift is
  # numerically safe here (|scores| <= A so exponents stay >> f32 underflow)
  m = jnp.max(scores, axis=0, keepdims=True)                           # [1, 1]
  ex = jnp.exp(scores - m)                                             # [B*S, 1]

  # weighted encoder rep + softmax denominator in ONE segment-matrix MXU dot
  xw = jnp.concatenate([ex * encf, ex], axis=1)                        # [B*S, DE+1]
  wsum = jnp.dot(seg, xw, preferred_element_type=f32)                  # [B, DE+1]
  weighted = wsum[:, :DE] / wsum[:, DE:]                               # [B, DE]

  # ---------- fused single-step GRU (PyTorch gate order: r, z, n) ----------
  x_aug = jnp.concatenate([emb, weighted, ones_b], axis=1)             # [B, E+DE+1]
  gi = jnp.dot(x_aug, wih_ref[...], preferred_element_type=f32)        # [B, 3H] (+ bih)
  r = jax.nn.sigmoid(gi[:, :H] + gh[:, :H])
  z = jax.nn.sigmoid(gi[:, H:2 * H] + gh[:, H:2 * H])
  n = jnp.tanh(gi[:, 2 * H:] + r * gh[:, 2 * H:])
  h_new = (1.0 - z) * n + z * h                                        # [B, H]

  # ---------- output projection: one 128-lane dot emits [logits | h_new | 0] ----------
  y_aug = jnp.concatenate([h_new, weighted, emb, ones_b], axis=1)      # [B, H+DE+E+1]
  out_ref[...] = jnp.dot(y_aug, wout_ref[...], preferred_element_type=f32)  # [B, 128]


def init_params(key):
  ks = jax.random.split(key, 9)
  w = lambda k, shape: (0.1 * jax.random.normal(k, shape, jnp.float32))
  return dict(
      emb=w(ks[0], (V, E)),                                    # nn.Embedding(V, E)
      Wa=w(ks[1], (A, ATTN_IN)), ba=w(ks[2], (A,)),            # attention.attn
      Wih=w(ks[3], (3 * H, E + DE)), Whh=w(ks[4], (3 * H, H)),  # nn.GRU
      bih=w(ks[5], (3 * H,)), bhh=w(ks[6], (3 * H,)),
      Wout=w(ks[7], (V, ATTN_IN + E)), bout=w(ks[8], (V,)),    # nn.Linear out
  )


def pack_params(p):
  """One-time host-side packing: transposes, fusions and folded biases."""
  f32 = jnp.float32
  WaT = p['Wa'].T                                      # [H+DE, A]

  # [Whh.T | Wa_hidden.T] with a trailing bias row (bhh | ba)  -> [H+1, 3H+A]=[33,128]
  wh = jnp.zeros((H + 1, 3 * H + A), f32)
  wh = wh.at[:H, :3 * H].set(p['Whh'].T)
  wh = wh.at[H, :3 * H].set(p['bhh'])
  wh = wh.at[:H, 3 * H:].set(WaT[:H, :])
  wh = wh.at[H, 3 * H:].set(p['ba'])

  # encoder part of the attention weight                 -> [DE, A]
  wenc = WaT[H:, :]

  # GRU input weight with bias row                       -> [E+DE+1, 3H]
  wih = jnp.zeros((E + DE + 1, 3 * H), f32)
  wih = wih.at[:E + DE, :].set(p['Wih'].T)
  wih = wih.at[E + DE, :].set(p['bih'])

  # output projection, lane-dense 128 wide:
  #   cols 0:V      = Wout.T (+ bout bias row)
  #   cols V:V+H    = identity block copying h_new
  #   cols V+H:128  = zero padding
  wout = jnp.zeros((H + DE + E + 1, OUT_W), f32)
  wout = wout.at[:H + DE + E, :V].set(p['Wout'].T)
  wout = wout.at[H + DE + E, :V].set(p['bout'])
  wout = wout.at[:H, V:V + H].set(jnp.eye(H, dtype=f32))

  return dict(emb_table=p['emb'], wh=wh, wenc=wenc, wih=wih, wout=wout)


@jax.jit
def decoder_forward(packed, input_ids, decoder_hidden, encoder_outputs):
  """input_ids [B] int32, decoder_hidden [B,H], encoder_outputs [S,B,DE]."""
  embedded = jnp.take(packed['emb_table'], input_ids, axis=0)          # [B, E]
  enc_flat = jnp.transpose(encoder_outputs, (1, 0, 2)).reshape(B * S, DE)  # [B*S, DE]

  flops = 2 * (B * (H + 1) * (3 * H + A)
               + (B * S) * DE * A
               + (B * S) * B * A
               + B * (B * S) * (DE + 1)
               + B * (E + DE + 1) * 3 * H
               + B * (H + DE + E + 1) * OUT_W)
  transcendentals = B * S * A + B * S + 3 * B * H
  bytes_accessed = 4 * (B * E + B * H + B * S * DE
                        + (H + 1) * (3 * H + A) + DE * A
                        + (E + DE + 1) * 3 * H + (H + DE + E + 1) * OUT_W
                        + B * OUT_W)

  vspec = pl.BlockSpec(memory_space=pltpu.MemorySpace.VMEM)  # whole array in VMEM
  out = pl.pallas_call(
      _decoder_kernel,
      out_shape=jax.ShapeDtypeStruct((B, OUT_W), jnp.float32),
      in_specs=[vspec] * 7,
      out_specs=vspec,
      cost_estimate=pl.CostEstimate(flops=flops,
                                    transcendentals=transcendentals,
                                    bytes_accessed=bytes_accessed),
  )(embedded, decoder_hidden, enc_flat,
    packed['wh'], packed['wenc'], packed['wih'], packed['wout'])

  logits = out[:, :V]
  h_new = out[:, V:V + H]
  return logits, h_new


def reference_forward(params, input_ids, decoder_hidden, encoder_outputs):
  """Pure-JAX reference mirroring the PyTorch forward exactly (eval mode)."""
  embedded = params['emb'][input_ids]                             # [B, E]
  h = decoder_hidden                                              # [B, H]
  enc_bf = jnp.transpose(encoder_outputs, (1, 0, 2))              # [B, S, DE]
  rep = jnp.repeat(h[:, None, :], encoder_outputs.shape[0], axis=1)
  cat = jnp.concatenate([rep, enc_bf], axis=2)                    # [B, S, ATTN_IN]
  energy = jnp.tanh(cat @ params['Wa'].T + params['ba'])
  a = jax.nn.softmax(energy.sum(-1), axis=1)                      # [B, S]
  weighted = jnp.einsum('bs,bsd->bd', a, enc_bf)                  # [B, DE]
  x = jnp.concatenate([embedded, weighted], axis=1)
  gi = x @ params['Wih'].T + params['bih']
  gh = h @ params['Whh'].T + params['bhh']
  r = jax.nn.sigmoid(gi[:, :H] + gh[:, :H])
  z = jax.nn.sigmoid(gi[:, H:2 * H] + gh[:, H:2 * H])
  n = jnp.tanh(gi[:, 2 * H:] + r * gh[:, 2 * H:])
  h_new = (1.0 - z) * n + z * h
  out = (jnp.concatenate([h_new, weighted, embedded], axis=1) @ params['Wout'].T
         + params['bout'])
  return out, h_new


if __name__ == "__main__":
  key = jax.random.PRNGKey(0)
  pkey, k1, k2, k3 = jax.random.split(key, 4)
  params = init_params(pkey)
  packed = pack_params(params)        # packed ONCE, not per call

  input_ids = jax.random.randint(k1, (B,), 0, V, dtype=jnp.int32)
  decoder_hidden = jax.random.normal(k2, (B, H), jnp.float32)
  encoder_outputs = jax.random.normal(k3, (S, B, DE), jnp.float32)

  logits, h_new = decoder_forward(packed, input_ids, decoder_hidden, encoder_outputs)
  jax.block_until_ready((logits, h_new))

  ref_logits, ref_h = reference_forward(params, input_ids, decoder_hidden, encoder_outputs)
  np.testing.assert_allclose(np.asarray(logits), np.asarray(ref_logits), rtol=1e-4, atol=1e-4)
  np.testing.assert_allclose(np.asarray(h_new), np.asarray(ref_h), rtol=1e-4, atol=1e-4)

  assert logits.shape == (B, V) and h_new.shape == (B, H)
  print("KERNEL_OK")
</pallas_src>

<mosaic_0001>
module attributes {stable_mosaic.version = 11 : i64} {
  func.func @_decoder_kernel(%arg0: memref<2x16xf32, #tpu.memory_space<vmem>>, %arg1: memref<2x32xf32, #tpu.memory_space<vmem>>, %arg2: memref<16x32xf32, #tpu.memory_space<vmem>>, %arg3: memref<33x128xf32, #tpu.memory_space<vmem>>, %arg4: memref<32x32xf32, #tpu.memory_space<vmem>>, %arg5: memref<49x96xf32, #tpu.memory_space<vmem>>, %arg6: memref<81x128xf32, #tpu.memory_space<vmem>>, %arg7: memref<2x128xf32, #tpu.memory_space<vmem>>) attributes {dimension_semantics = [], scalar_prefetch = 0 : i64, scratch_operands = 0 : i64, tpu.core_type = #tpu.core_type<tc>} {
    %c0 = arith.constant 0 : index
    %c0_0 = arith.constant 0 : index
    %0 = vector.load %arg0[%c0, %c0_0] : memref<2x16xf32, #tpu.memory_space<vmem>>, vector<2x16xf32>
    %c0_1 = arith.constant 0 : index
    %c0_2 = arith.constant 0 : index
    %1 = vector.load %arg1[%c0_1, %c0_2] : memref<2x32xf32, #tpu.memory_space<vmem>>, vector<2x32xf32>
    %c0_3 = arith.constant 0 : index
    %c0_4 = arith.constant 0 : index
    %2 = vector.load %arg2[%c0_3, %c0_4] : memref<16x32xf32, #tpu.memory_space<vmem>>, vector<16x32xf32>
    %cst = arith.constant 1.000000e+00 : f32
    %3 = vector.broadcast %cst : f32 to vector<2x1xf32>
    %4 = tpu.concatenate %1, %3 in 1 : vector<2x32xf32>, vector<2x1xf32> -> vector<2x33xf32>
    %c0_5 = arith.constant 0 : index
    %c0_6 = arith.constant 0 : index
    %5 = vector.load %arg3[%c0_5, %c0_6] : memref<33x128xf32, #tpu.memory_space<vmem>>, vector<33x128xf32>
    %cst_7 = arith.constant dense<0.000000e+00> : vector<2x128xf32>
    %6 = tpu.matmul %4, %5, %cst_7 {dimension_numbers = #tpu.dot_dimension_numbers<[1], [0], [0], [1], [0, 0, 1, 1], [], []>} : vector<2x33xf32>, vector<33x128xf32>, vector<2x128xf32> -> vector<2x128xf32>
    %7 = vector.extract_strided_slice %6 {offsets = [0, 0], sizes = [2, 96], strides = [1, 1]} : vector<2x128xf32> to vector<2x96xf32>
    %8 = vector.extract_strided_slice %6 {offsets = [0, 96], sizes = [2, 32], strides = [1, 1]} : vector<2x128xf32> to vector<2x32xf32>
    %c0_8 = arith.constant 0 : index
    %c0_9 = arith.constant 0 : index
    %9 = vector.load %arg4[%c0_8, %c0_9] : memref<32x32xf32, #tpu.memory_space<vmem>>, vector<32x32xf32>
    %cst_10 = arith.constant dense<0.000000e+00> : vector<16x32xf32>
    %10 = tpu.matmul %2, %9, %cst_10 {dimension_numbers = #tpu.dot_dimension_numbers<[1], [0], [0], [1], [0, 0, 1, 1], [], []>} : vector<16x32xf32>, vector<32x32xf32>, vector<16x32xf32> -> vector<16x32xf32>
    %11 = tpu.iota {dimensions = array<i32: 0>} : vector<16x2xi32>
    %12 = tpu.iota {dimensions = array<i32: 1>} : vector<16x2xi32>
    %c8_i32 = arith.constant 8 : i32
    %13 = vector.broadcast %c8_i32 : i32 to vector<16x2xi32>
    %14 = arith.muli %12, %13 : vector<16x2xi32>
    %15 = arith.cmpi sge, %11, %14 : vector<16x2xi32>
    %c1_i32 = arith.constant 1 : i32
    %16 = vector.broadcast %c1_i32 : i32 to vector<16x2xi32>
    %17 = arith.addi %12, %16 : vector<16x2xi32>
    %c8_i32_11 = arith.constant 8 : i32
    %18 = vector.broadcast %c8_i32_11 : i32 to vector<16x2xi32>
    %19 = arith.muli %17, %18 : vector<16x2xi32>
    %20 = arith.cmpi slt, %11, %19 : vector<16x2xi32>
    %21 = arith.andi %15, %20 : vector<16x2xi1>
    %22 = arith.extui %21 : vector<16x2xi1> to vector<16x2xi32>
    %23 = arith.sitofp %22 : vector<16x2xi32> to vector<16x2xf32>
    %24 = tpu.iota {dimensions = array<i32: 0>} : vector<2x16xi32>
    %25 = tpu.iota {dimensions = array<i32: 1>} : vector<2x16xi32>
    %c8_i32_12 = arith.constant 8 : i32
    %26 = vector.broadcast %c8_i32_12 : i32 to vector<2x16xi32>
    %27 = arith.muli %24, %26 : vector<2x16xi32>
    %28 = arith.cmpi sge, %25, %27 : vector<2x16xi32>
    %c1_i32_13 = arith.constant 1 : i32
    %29 = vector.broadcast %c1_i32_13 : i32 to vector<2x16xi32>
    %30 = arith.addi %24, %29 : vector<2x16xi32>
    %c8_i32_14 = arith.constant 8 : i32
    %31 = vector.broadcast %c8_i32_14 : i32 to vector<2x16xi32>
    %32 = arith.muli %30, %31 : vector<2x16xi32>
    %33 = arith.cmpi slt, %25, %32 : vector<2x16xi32>
    %34 = arith.andi %28, %33 : vector<2x16xi1>
    %35 = arith.extui %34 : vector<2x16xi1> to vector<2x16xi32>
    %36 = arith.sitofp %35 : vector<2x16xi32> to vector<2x16xf32>
    %cst_15 = arith.constant dense<0.000000e+00> : vector<16x32xf32>
    %37 = tpu.matmul %23, %8, %cst_15 {dimension_numbers = #tpu.dot_dimension_numbers<[1], [0], [0], [1], [0, 0, 1, 1], [], []>} : vector<16x2xf32>, vector<2x32xf32>, vector<16x32xf32> -> vector<16x32xf32>
    %38 = arith.addf %10, %37 : vector<16x32xf32>
    %39 = math.tanh %38 : vector<16x32xf32>
    %cst_16 = arith.constant dense<0.000000e+00> : vector<16xf32>
    %40 = vector.multi_reduction <add>, %39, %cst_16 [1] : vector<16x32xf32> to vector<16xf32>
    %41 = vector.shape_cast %40 : vector<16xf32> to vector<16x1xf32>
    %cst_17 = arith.constant dense<0xFF800000> : vector<1xf32>
    %42 = vector.multi_reduction <maximumf>, %41, %cst_17 [0] : vector<16x1xf32> to vector<1xf32>
    %43 = vector.shape_cast %42 : vector<1xf32> to vector<1x1xf32>
    %44 = vector.broadcast %43 : vector<1x1xf32> to vector<16x1xf32>
    %45 = arith.subf %41, %44 : vector<16x1xf32>
    %46 = math.exp %45 : vector<16x1xf32>
    %47 = vector.broadcast %46 : vector<16x1xf32> to vector<16x32xf32>
    %48 = arith.mulf %47, %2 : vector<16x32xf32>
    %49 = tpu.concatenate %48, %46 in 1 : vector<16x32xf32>, vector<16x1xf32> -> vector<16x33xf32>
    %cst_18 = arith.constant dense<0.000000e+00> : vector<2x33xf32>
    %50 = tpu.matmul %36, %49, %cst_18 {dimension_numbers = #tpu.dot_dimension_numbers<[1], [0], [0], [1], [0, 0, 1, 1], [], []>} : vector<2x16xf32>, vector<16x33xf32>, vector<2x33xf32> -> vector<2x33xf32>
    %51 = vector.extract_strided_slice %50 {offsets = [0, 0], sizes = [2, 32], strides = [1, 1]} : vector<2x33xf32> to vector<2x32xf32>
    %52 = vector.extract_strided_slice %50 {offsets = [0, 32], sizes = [2, 1], strides = [1, 1]} : vector<2x33xf32> to vector<2x1xf32>
    %53 = vector.broadcast %52 : vector<2x1xf32> to vector<2x32xf32>
    %54 = arith.divf %51, %53 : vector<2x32xf32>
    %55 = tpu.concatenate %0, %54, %3 in 1 : vector<2x16xf32>, vector<2x32xf32>, vector<2x1xf32> -> vector<2x49xf32>
    %c0_19 = arith.constant 0 : index
    %c0_20 = arith.constant 0 : index
    %56 = vector.load %arg5[%c0_19, %c0_20] : memref<49x96xf32, #tpu.memory_space<vmem>>, vector<49x96xf32>
    %cst_21 = arith.constant dense<0.000000e+00> : vector<2x96xf32>
    %57 = tpu.matmul %55, %56, %cst_21 {dimension_numbers = #tpu.dot_dimension_numbers<[1], [0], [0], [1], [0, 0, 1, 1], [], []>} : vector<2x49xf32>, vector<49x96xf32>, vector<2x96xf32> -> vector<2x96xf32>
    %58 = vector.extract_strided_slice %57 {offsets = [0, 0], sizes = [2, 32], strides = [1, 1]} : vector<2x96xf32> to vector<2x32xf32>
    %59 = vector.extract_strided_slice %7 {offsets = [0, 0], sizes = [2, 32], strides = [1, 1]} : vector<2x96xf32> to vector<2x32xf32>
    %60 = arith.addf %58, %59 : vector<2x32xf32>
    %61 = arith.negf %60 : vector<2x32xf32>
    %62 = math.exp %61 : vector<2x32xf32>
    %cst_22 = arith.constant 1.000000e+00 : f32
    %63 = vector.broadcast %cst_22 : f32 to vector<2x32xf32>
    %64 = arith.addf %63, %62 : vector<2x32xf32>
    %65 = arith.divf %63, %64 : vector<2x32xf32>
    %66 = vector.extract_strided_slice %57 {offsets = [0, 32], sizes = [2, 32], strides = [1, 1]} : vector<2x96xf32> to vector<2x32xf32>
    %67 = vector.extract_strided_slice %7 {offsets = [0, 32], sizes = [2, 32], strides = [1, 1]} : vector<2x96xf32> to vector<2x32xf32>
    %68 = arith.addf %66, %67 : vector<2x32xf32>
    %69 = arith.negf %68 : vector<2x32xf32>
    %70 = math.exp %69 : vector<2x32xf32>
    %cst_23 = arith.constant 1.000000e+00 : f32
    %71 = vector.broadcast %cst_23 : f32 to vector<2x32xf32>
    %72 = arith.addf %71, %70 : vector<2x32xf32>
    %73 = arith.divf %71, %72 : vector<2x32xf32>
    %74 = vector.extract_strided_slice %57 {offsets = [0, 64], sizes = [2, 32], strides = [1, 1]} : vector<2x96xf32> to vector<2x32xf32>
    %75 = vector.extract_strided_slice %7 {offsets = [0, 64], sizes = [2, 32], strides = [1, 1]} : vector<2x96xf32> to vector<2x32xf32>
    %76 = arith.mulf %65, %75 : vector<2x32xf32>
    %77 = arith.addf %74, %76 : vector<2x32xf32>
    %78 = math.tanh %77 : vector<2x32xf32>
    %cst_24 = arith.constant 1.000000e+00 : f32
    %79 = vector.broadcast %cst_24 : f32 to vector<2x32xf32>
    %80 = arith.subf %79, %73 : vector<2x32xf32>
    %81 = arith.mulf %80, %78 : vector<2x32xf32>
    %82 = arith.mulf %73, %1 : vector<2x32xf32>
    %83 = arith.addf %81, %82 : vector<2x32xf32>
    %84 = tpu.concatenate %83, %54, %0, %3 in 1 : vector<2x32xf32>, vector<2x32xf32>, vector<2x16xf32>, vector<2x1xf32> -> vector<2x81xf32>
    %c0_25 = arith.constant 0 : index
    %c0_26 = arith.constant 0 : index
    %85 = vector.load %arg6[%c0_25, %c0_26] : memref<81x128xf32, #tpu.memory_space<vmem>>, vector<81x128xf32>
    %cst_27 = arith.constant dense<0.000000e+00> : vector<2x128xf32>
    %86 = tpu.matmul %84, %85, %cst_27 {dimension_numbers = #tpu.dot_dimension_numbers<[1], [0], [0], [1], [0, 0, 1, 1], [], []>} : vector<2x81xf32>, vector<81x128xf32>, vector<2x128xf32> -> vector<2x128xf32>
    %c0_28 = arith.constant 0 : index
    %c0_29 = arith.constant 0 : index
    %87 = vector.load %arg7[%c0_28, %c0_29] : memref<2x128xf32, #tpu.memory_space<vmem>>, vector<2x128xf32>
    tpu.vector_store %arg7[%c0_28, %c0_29], %86 {strides = array<i32>} : memref<2x128xf32, #tpu.memory_space<vmem>>, vector<2x128xf32>,
    return
  }
}

</mosaic_0001>

<bundles_post_ra>
// kernel: decoder_forward.1
= control target key start
LH: loop header
LB: loop body
LE: loop exit
PB: predicated region body
PF: predicated region fallthrough
CT: control target
= control target key end

     0   :  { %12 = vsyncpa [#allocation3], 0  ;;  %s1093_s0 = inlined_call_operand.vmem [shape: f32[2,16], index: 0, kind: input, shape index: {}]   ;;  %s1094_s1 = inlined_call_operand.vmem [shape: f32[2,32], index: 1, kind: input, shape index: {}]   ;;  %s1095_s2 = inlined_call_operand.vmem [shape: f32[16,32], index: 2, kind: input, shape index: {}]   ;;  %s1096_s3 = inlined_call_operand.hbm [shape: f32[33,128], index: 3, kind: input, shape index: {}]   ;;  %s1097_s4 = inlined_call_operand.hbm [shape: f32[32,32], index: 4, kind: input, shape index: {}]   ;;  %s1098_s5 = inlined_call_operand.vmem [shape: f32[49,96], index: 5, kind: input, shape index: {}]   ;;  %s1099_s6 = inlined_call_operand.vmem [shape: f32[81,128], index: 6, kind: input, shape index: {}]   ;;  %s1100_s7 = inlined_call_operand.vmem [shape: f32[2,128], index: 7, kind: output, shape index: {}]  }
   0x1   :  { %13 = vsyncpa [#allocation5], 0  ;;  %s884_s24 = smov [#allocation2]  }
   0x2   :  { %s25_s25 = sshll.u32 %s884_s24, 4  ;;  %s26_s25 = int_to_ptr.vmem [resolvable:$true] %s25_s25 }
   0x3   :  { %s848_s26 = scalar_lea.vmem %s26_s25, 640  ;;  %p853_p1 = scmp.lt.s32.totalorder %s26_s25, %s26_s25 }
   0x4   :  { %p849_p0 = scmp.ne.s32.totalorder %s26_s25, %s848_s26  ;;  %p854_p2 = scmp.lt.s32.totalorder %s848_s26, %s848_s26 }
   0x6   :  { %p855_p3 = por %p854_p2, %p853_p1 }
   0x8   :  { %p856_p4 = pnand %p855_p3, %p849_p0 }
   0xa   :  { %859 = shalt.err (!%p856_p4)
}
   0xb   :  { %s885_s27 = smov 128   ;;  %s886_s28 = smov 8  }
   0xc   :  { %31 = dma.hbm_to_vmem [thread:$0]  %s1096_s3, 640, %s26_s25, [#allocation3], %s885_s27, %s885_s27, %s886_s28  }
   0xd   :  { %s887_s8 = smov [#allocation4]  }
   0xe   :  { %s37_s9 = sshll.u32 %s887_s8, 4  ;;  %s38_s9 = int_to_ptr.vmem [resolvable:$true] %s37_s9 }
   0xf   :  { %s868_s10 = scalar_lea.vmem %s38_s9, 512  ;;  %p873_p6 = scmp.lt.s32.totalorder %s38_s9, %s38_s9 }
  0x10   :  { %p869_p5 = scmp.ne.s32.totalorder %s38_s9, %s868_s10  ;;  %p874_p7 = scmp.lt.s32.totalorder %s868_s10, %s868_s10 }
  0x12   :  { %p875_p8 = por %p874_p7, %p873_p6 }
  0x14   :  { %p876_p9 = pnand %p875_p8, %p869_p5 }
  0x16   :  { %879 = shalt.err (!%p876_p9)
}
  0x17   :  { %43 = dma.hbm_to_vmem [thread:$0]  %s1097_s4, 512, %s38_s9, [#allocation5], %s885_s27, %s885_s27, %s886_s28  }
  0x18   :  { %880 = dma.done.wait [#allocation3], 640  }
  0x19   :  { %881 = vsyncadd [#allocation3], 4294966656 }
  0x1a   :  { %882 = dma.done.wait [#allocation5], 512  }
  0x1b   :  { %883 = vsyncadd [#allocation5], 4294966784  ;;  %v888_v0 = vmov 0.0   ;;  %vm889_vm0 = vmmov 0   ;;  %vm69_vm1 = vcmask 1040384   ;;  %v63_v2 = vld [vmem:[#allocation2 + $0x18] sm:$0xff]  ;;  %v147_v8 = vlaneseq }
  0x1c   :  { %733 = vmatprep.subr.mxu0 %v888_v0  ;;  %743 = vmatprep.mubr.msk.f32.mxu0 %vm889_vm0, %v888_v0  ;;  %v64_v1 = vld [vmem:[#allocation2 + $0x20] sm:$0x1]  ;;  %v62_v3 = vld [vmem:[#allocation2 + $0x10] sm:$0xff]  ;;  %v61_v4 = vld [vmem:[#allocation2 + $0x8] sm:$0xff]  ;;  %vm58_vm2 = vcmask 261120   ;;  %vm65_vm3 = vcmask 269312  }
  0x1d   :  { %734 = vmatpush3.msk.msra.mxu0 %vm69_vm1, %v64_v1  ;;  %v950_v5 = vld [vmem:[%s1094_s1] sm:$0x3]  ;;  %v959_v9 = vand.u32 127, %v147_v8  ;;  %v962_v11 = vshrl.u32 %v147_v8, 7  ;;  %vm176_vm9 = vcmask 15360   ;;  %s890_s1 = smov 32  }
  0x1e   :  { %735 = vmatprep.subr.mxu0 %v888_v0  ;;  %v60_v6 = vld [vmem:[#allocation2] sm:$0xff]  ;;  %v59_v7 = vsel %vm58_vm2, %v950_v5, 1.0  ;;  %vm183_vm11 = vcmask 1041408   ;;  %v145_v22 = vld [vmem:[#allocation4 + $0x10] sm:$0xff]  ;;  %v144_v23 = vld [vmem:[#allocation4 + $0x8] sm:$0xff]  ;;  %v891_v36 = vmov 32  }
  0x1f   :  { %736 = vmatpush3.msra.mxu0 %v63_v2  ;;  %v155_v10 = vadd.s32 1, %v959_v9  ;;  %v152_v12 = vmul.u32 8, %v959_v9  ;;  %v149_v14 = vadd.s32 8, %v962_v11  ;;  %v146_v20 = vld [vmem:[#allocation4 + $0x18] sm:$0xff]  ;;  %v143_v24 = vld [vmem:[#allocation4] sm:$0xff]  ;;  %822 = vset.pattern.permute.xlu1 %v891_v36  ;;  %v167_v50 = vadd.s32 1, %v962_v11 }
  0x20   :  { %737 = vmatprep.subr.mxu0 %v888_v0  ;;  %v56_v21 = vld [vmem:[%s1095_s2] sm:$0xff]  ;;  %v57_v25 = vld [vmem:[%s1095_s2 + $0x8] sm:$0xff]  ;;  %823 = vset.pattern.permute.xlu0 %v891_v36  ;;  %v165_v51 = vmul.u32 8, %v962_v11  ;;  %vm367_vm15 = vcmask 130048   ;;  %v461_v62 = vld [vmem:[%s1098_s5 + $0x30] sm:$0x1] }
  0x21   :  { %738 = vmatpush3.msra.mxu0 %v62_v3  ;;  %v156_v13 = vmul.u32 8, %v155_v10  ;;  %vm153_vm4 = vcmp.ge.s32.totalorder %v962_v11, %v152_v12  ;;  %vm154_vm7 = vcmp.ge.s32.totalorder %v149_v14, %v152_v12  ;;  %v168_v52 = vmul.u32 8, %v167_v50  ;;  %v460_v63 = vld [vmem:[%s1098_s5 + $0x28] sm:$0xff]  ;;  %v459_v1 = vld [vmem:[%s1098_s5 + $0x20] sm:$0xff]  ;;  %v458_v2 = vld [vmem:[%s1098_s5 + $0x18] sm:$0xff]  ;;  %s892_s30 = smov 16  }
  0x22   :  { %739 = vmatprep.subr.mxu0 %v888_v0  ;;  %vm166_vm12 = vcmp.ge.s32.totalorder %v959_v9, %v165_v51  ;;  %v457_v3 = vld [vmem:[%s1098_s5 + $0x10] sm:$0xff]  ;;  %s893_s8 = smov 64   ;;  %s894_s15 = smov 96  }
  0x23   :  { %740 = vmatpush3.msra.mxu0 %v61_v4  ;;  %vm157_vm5 = vcmp.lt.s32.totalorder %v962_v11, %v156_v13  ;;  %vm158_vm8 = vcmp.lt.s32.totalorder %v149_v14, %v156_v13  ;;  %vm169_vm13 = vcmp.lt.s32.totalorder %v959_v9, %v168_v52  ;;  %v456_v4 = vld [vmem:[%s1098_s5 + $0x8] sm:$0xff]  ;;  %v1034_v9 = vld [vmem:[%s1093_s0] sm:$0x3] }
  0x24   :  { %741 = vmatprep.subr.mxu0 %v888_v0  ;;  %vm159_vm6 = vmand %vm153_vm4, %vm157_vm5  ;;  %vm582_vm4 = vcmask 654336   ;;  %vm595_vm5 = vcmask 662528  }
  0x25   :  { %742 = vmatpush3.msra.mxu0 %v60_v6  ;;  %v681_v15 = vsel %vm159_vm6, 1.0, %v888_v0  ;;  %vm160_vm10 = vmand %vm154_vm7, %vm158_vm8  ;;  %v455_v6 = vld [vmem:[%s1098_s5] sm:$0xff] }
  0x26   :  { %744 = vmatmul.mubr.msk.f32.vlgmr.msra.gmra.mxu0 %vm65_vm3, %v59_v7  ;;  %786 = vmatprep.subr.mxu0 %v888_v0  ;;  %v682_v19 = vsel %vm160_vm10, 1.0, %v888_v0  ;;  %vm170_vm14 = vmand %vm166_vm12, %vm169_vm13  ;;  %vm462_vm3 = vcmask 400384  }
  0x27   :  { %808 = vmatprep.mubr.msk.f32.mxu0 %vm889_vm0, %v888_v0  ;;  %748 = vmatprep.mubr.msk.f32.mxu1 %vm176_vm9, %v681_v15  ;;  %v683_v58 = vsel %vm170_vm14, 1.0, %v888_v0 }
  0xe6   :  { %v969_v16 = vpop.f32.mrf.mxu0 }
  0xe7   :  { %174 = vrot.lane.b32.xlu0 %v969_v16, %s890_s1 }
  0xe8   :  { %v745_v17 = vpop.f32.mrf.mxu0 }
 0x159   :  { %v175_v18 = vpop.permute.xlu0 %174 }
 0x15a   :  { %746 = vmatprep.subr.msk.mxu1 %vm183_vm11, %v175_v18 }
 0x15b   :  { %747 = vmatpush3.msk.msra.mxu1 %vm183_vm11, %v175_v18 }
 0x15c   :  { %749 = vmatmul.mubr.msk.f32.vlgmr.msra.gmra.mxu1 %vm176_vm9, %v682_v19  ;;  %751 = vmatprep.subr.mxu1 %v146_v20 }
 0x15d   :  { %752 = vmatpush3.msra.mxu1 %v146_v20  ;;  %759 = vmatprep.mubr.msk.f32.mxu1 %vm58_vm2, %v56_v21 }
 0x15e   :  { %753 = vmatprep.subr.mxu1 %v145_v22 }
 0x15f   :  { %754 = vmatpush3.msra.mxu1 %v145_v22 }
 0x160   :  { %755 = vmatprep.subr.mxu1 %v144_v23 }
 0x161   :  { %756 = vmatpush3.msra.mxu1 %v144_v23 }
 0x162   :  { %757 = vmatprep.subr.mxu1 %v143_v24 }
 0x163   :  { %758 = vmatpush3.msra.mxu1 %v143_v24 }
 0x164   :  { %760 = vmatmul.mubr.msk.f32.vlgmr.msra.gmra.mxu1 %vm58_vm2, %v57_v25  ;;  %762 = vmatprep.subr.mxu1 %v888_v0 }
 0x165   :  { %766 = vmatprep.mubr.msk.f32.mxu1 %vm889_vm0, %v888_v0 }
 0x21c   :  { %v750_v26 = vpop.f32.mrf.mxu1 }
 0x21e   :  { %v252_v27 = vpop.f32.mrf.mxu1 }
 0x224   :  { %v761_v28 = vpop.f32.mrf.mxu1 }
 0x225   :  { %v339_v29 = vadd.f32 %v761_v28, %v750_v26  ;;  %v592_v26 = vld [vmem:[%s1099_s6 + $0x40] sm:$0xff]  ;;  %v591_v28 = vld [vmem:[%s1099_s6 + $0x38] sm:$0xff] }
 0x226   :  { %v333_v30 = vpop.f32.mrf.mxu1 }
 0x227   :  { %824 = vtanh.f32 %v339_v29  ;;  %v334_v31 = vadd.f32 %v333_v30, %v252_v27  ;;  %v590_v29 = vld [vmem:[%s1099_s6 + $0x30] sm:$0xff]  ;;  %v589_v30 = vld [vmem:[%s1099_s6 + $0x28] sm:$0xff] }
 0x229   :  { %826 = vtanh.f32 %v334_v31  ;;  %v588_v31 = vld [vmem:[%s1099_s6 + $0x20] sm:$0xff] }
 0x234   :  { %v825_v32 = vpop.eup %824 }
 0x235   :  { %v347_v33 = vsel %vm58_vm2, %v825_v32, 0.0  ;;  %v587_v32 = vld [vmem:[%s1099_s6 + $0x18] sm:$0xff] }
 0x236   :  { %v827_v34 = vpop.eup %826  ;;  %348 = vadd.xlane.f32.xlu1 %v347_v33  ;;  %v586_v33 = vld [vmem:[%s1099_s6 + $0x10] sm:$0xff] }
 0x237   :  { %v344_v35 = vsel %vm58_vm2, %v827_v34, 0.0  ;;  %v585_v34 = vld [vmem:[%s1099_s6 + $0x8] sm:$0xff] }
 0x238   :  { %345 = vadd.xlane.f32.xlu0 %v344_v35  ;;  %v584_v35 = vld [vmem:[%s1099_s6] sm:$0xff] }
 0x24e   :  { %563 = vrot.lane.b32.xlu0 %v950_v5, %s890_s1 }
 0x2bf   :  { %v349_v37 = vpop.xlane.xlu1 %348 }
 0x2c1   :  { %v346_v38 = vpop.xlane.xlu0 %345 }
 0x2c2   :  { %v350_v39 = vmax.f32 %v346_v38, %v349_v37 }
 0x2c4   :  { %v351_v40 = vrot.slane %v350_v39, 4 }
 0x2c5   :  { %v564_v36 = vpop.permute.xlu0 %563 }
 0x2c6   :  { %v352_v41 = vmax.f32 %v350_v39, %v351_v40 }
 0x2c8   :  { %v353_v42 = vrot.slane %v352_v41, 2 }
 0x2ca   :  { %v354_v43 = vmax.f32 %v352_v41, %v353_v42 }
 0x2cc   :  { %v355_v44 = vrot.slane %v354_v43, 1 }
 0x2ce   :  { %v356_v45 = vmax.f32 %v354_v43, %v355_v44 }
 0x2d0   :  { %v357_v46 = vsub.f32 %v346_v38, %v356_v45  ;;  %v358_v47 = vsub.f32 %v349_v37, %v356_v45 }
 0x2d2   :  { %v359_v48 = vmul.f32 1.442695, %v357_v46  ;;  %v361_v49 = vmul.f32 1.442695, %v358_v47 }
 0x2d4   :  { %828 = vpow2.f32 %v359_v48 }
 0x2d5   :  { %830 = vpow2.f32 %v361_v49 }
 0x2e1   :  { %v829_v53 = vpop.eup %828 }
 0x2e2   :  { %v831_v54 = vpop.eup %830  ;;  %v363_v56 = vmul.f32 %v829_v53, %v56_v21 }
 0x2e3   :  { %v364_v55 = vmul.f32 %v831_v54, %v57_v25  ;;  %v594_v25 = vld [vmem:[%s1099_s6 + $0x50] sm:$0x1] }
 0x2e4   :  { %v365_v59 = vsel %vm58_vm2, %v363_v56, %v829_v53  ;;  %787 = vmatpush3.msk.msra.mxu0 %vm69_vm1, %v594_v25 }
 0x2e5   :  { %v366_v57 = vsel %vm58_vm2, %v364_v55, %v831_v54  ;;  %788 = vmatprep.subr.mxu0 %v888_v0 }
 0x2e6   :  { %763 = vmatpush3.msra.mxu1 %v366_v57 }
 0x2e7   :  { %764 = vmatprep.subr.mxu1 %v888_v0 }
 0x2e8   :  { %765 = vmatpush3.msra.mxu1 %v365_v59 }
 0x2e9   :  { %767 = vmatmul.mubr.msk.f32.vlgmr.msra.gmra.mxu1 %vm367_vm15, %v683_v58  ;;  %769 = vmatprep.subr.mxu1 %v888_v0 }
 0x2ea   :  { %783 = vmatprep.mubr.msk.f32.mxu1 %vm889_vm0, %v888_v0  ;;  %770 = vmatpush3.msk.msra.mxu1 %vm69_vm1, %v461_v62  ;;  %vm453_vm0 = vcmask 392192   ;;  %vm580_vm1 = vcmask 523264  }
 0x2eb   :  { %771 = vmatprep.subr.mxu1 %v888_v0 }
 0x2ec   :  { %772 = vmatpush3.msra.mxu1 %v460_v63 }
 0x2ed   :  { %773 = vmatprep.subr.mxu1 %v888_v0 }
 0x2ee   :  { %774 = vmatpush3.msra.mxu1 %v459_v1 }
 0x2ef   :  { %775 = vmatprep.subr.mxu1 %v888_v0 }
 0x2f0   :  { %776 = vmatpush3.msra.mxu1 %v458_v2 }
 0x2f1   :  { %777 = vmatprep.subr.mxu1 %v888_v0 }
 0x2f2   :  { %778 = vmatpush3.msra.mxu1 %v457_v3 }
 0x2f3   :  { %779 = vmatprep.subr.mxu1 %v888_v0 }
 0x2f4   :  { %780 = vmatpush3.msra.mxu1 %v456_v4 }
 0x2f5   :  { %781 = vmatprep.subr.mxu1 %v888_v0 }
 0x2f6   :  { %782 = vmatpush3.msra.mxu1 %v455_v6 }
 0x3a9   :  { %v437_v60 = vpop.f32.mrf.mxu1 }
 0x3aa   :  { %443 = vperm.xlu1 %822, %v437_v60  }
 0x3ab   :  { %v768_v61 = vpop.f32.mrf.mxu1 }
 0x425   :  { %v444_v5 = vpop.permute.xlu1 %443 }
 0x426   :  { %832 = vrcp.f32 %v444_v5 }
 0x433   :  { %v833_v7 = vpop.eup %832 }
 0x434   :  { %v447_v8 = vmul.f32 %v833_v7, %v437_v60 }
 0x436   :  { %449 = vrot.lane.b32.xlu1 %v447_v8, %s892_s30 }
 0x43a   :  { %546 = vrot.lane.b32.xlu1 %v969_v16, %s893_s8 }
 0x4a8   :  { %v450_v10 = vpop.permute.xlu1 %449 }
 0x4a9   :  { %v452_v11 = vsel %vm367_vm15, %v1034_v9, %v450_v10 }
 0x4aa   :  { %v454_v12 = vsel %vm453_vm0, %v452_v11, 1.0 }
 0x4ab   :  { %784 = vmatmul.mubr.msk.f32.vlgmr.msra.gmra.mxu1 %vm462_vm3, %v454_v12 }
 0x4ac   :  { %v547_v21 = vpop.permute.xlu1 %546 }
 0x56b   :  { %v535_v13 = vpop.f32.mrf.mxu1 }
 0x56c   :  { %v539_v14 = vadd.f32 %v535_v13, %v969_v16  ;;  %v593_v16 = vld [vmem:[%s1099_s6 + $0x48] sm:$0xff] }
 0x56d   :  { %v785_v15 = vpop.f32.mrf.mxu1  ;;  %789 = vmatpush3.msra.mxu0 %v593_v16 }
 0x56e   :  { %v692_v17 = vmul.f32 -1.442695, %v539_v14  ;;  %790 = vmatprep.subr.mxu0 %v888_v0 }
 0x56f   :  { %791 = vmatpush3.msra.mxu0 %v592_v26 }
 0x570   :  { %834 = vpow2.f32 %v692_v17  ;;  %792 = vmatprep.subr.mxu0 %v888_v0 }
 0x571   :  { %793 = vmatpush3.msra.mxu0 %v591_v28 }
 0x572   :  { %794 = vmatprep.subr.mxu0 %v888_v0 }
 0x573   :  { %795 = vmatpush3.msra.mxu0 %v590_v29 }
 0x574   :  { %796 = vmatprep.subr.mxu0 %v888_v0 }
 0x575   :  { %797 = vmatpush3.msra.mxu0 %v589_v30 }
 0x576   :  { %798 = vmatprep.subr.mxu0 %v888_v0 }
 0x577   :  { %799 = vmatpush3.msra.mxu0 %v588_v31 }
 0x578   :  { %800 = vmatprep.subr.mxu0 %v888_v0 }
 0x579   :  { %801 = vmatpush3.msra.mxu0 %v587_v32 }
 0x57a   :  { %802 = vmatprep.subr.mxu0 %v888_v0 }
 0x57b   :  { %803 = vmatpush3.msra.mxu0 %v586_v33 }
 0x57c   :  { %804 = vmatprep.subr.mxu0 %v888_v0 }
 0x57d   :  { %v835_v18 = vpop.eup %834  ;;  %805 = vmatpush3.msra.mxu0 %v585_v34 }
 0x57e   :  { %v543_v19 = vadd.f32 1.0, %v835_v18  ;;  %806 = vmatprep.subr.mxu0 %v888_v0 }
 0x57f   :  { %807 = vmatpush3.msra.mxu0 %v584_v35 }
 0x580   :  { %836 = vrcp.f32 %v543_v19 }
 0x58d   :  { %v837_v20 = vpop.eup %836 }
 0x58e   :  { %v549_v22 = vmul.f32 %v837_v20, %v547_v21  ;;  %v556_v37 = vsub.f32 1.0, %v837_v20  ;;  %v566_v39 = vmul.f32 %v837_v20, %v564_v36 }
 0x590   :  { %551 = vrot.lane.b32.xlu1 %v549_v22, %s893_s8 }
 0x602   :  { %v552_v23 = vpop.permute.xlu1 %551 }
 0x603   :  { %v554_v24 = vadd.f32 %v552_v23, %v535_v13 }
 0x605   :  { %838 = vtanh.f32 %v554_v24 }
 0x612   :  { %v839_v27 = vpop.eup %838 }
 0x613   :  { %558 = vrot.lane.b32.xlu1 %v839_v27, %s894_s15 }
 0x617   :  { %572 = vrot.lane.b32.xlu1 %v447_v8, %s890_s1 }
 0x685   :  { %v559_v38 = vpop.permute.xlu1 %558 }
 0x686   :  { %v561_v40 = vmul.f32 %v559_v38, %v556_v37 }
 0x688   :  { %v567_v41 = vadd.f32 %v566_v39, %v561_v40 }
 0x689   :  { %v573_v42 = vpop.permute.xlu1 %572 }
 0x68a   :  { %569 = vrot.lane.b32.xlu1 %v567_v41, %s894_s15 }
 0x68e   :  { %576 = vrot.lane.b32.xlu1 %v1034_v9, %s893_s8 }
 0x6fc   :  { %v570_v43 = vpop.permute.xlu1 %569 }
 0x6fd   :  { %v579_v0 = vsel %vm58_vm2, %v570_v43, %v573_v42 }
 0x700   :  { %v577_v44 = vpop.permute.xlu1 %576 }
 0x701   :  { %v581_v45 = vsel %vm580_vm1, %v579_v0, %v577_v44 }
 0x702   :  { %v583_v46 = vsel %vm582_vm4, %v581_v45, 1.0 }
 0x703   :  { %809 = vmatmul.mubr.msk.f32.vlgmr.msra.gmra.mxu0 %vm595_vm5, %v583_v46 }
 0x7c3   :  { %v668_v47 = vpop.f32.mrf.mxu0 }
 0x7c4   :  { %672 = vst [vmem:[%s1100_s7] sm:$0x3] %v668_v47 }
 0x7c5   :  { %v810_v48 = vpop.f32.mrf.mxu0 }
 0x7c6   :  { %677 = vsyncpa [#allocation3], 1 }
 0x7c7   :  { %678 = vsyncpa [#allocation5], 1 }

</bundles_post_ra>
